<compile_context>
chip_gen: v6e
topology: v6e:2x2x1
jax: 0.10.0
libtpu: 0.0.40
codegen_flags: <defaults>
</compile_context>

<pallas_src>
import functools
import math

import jax
import jax.numpy as jnp
from jax.experimental import pallas as pl
from jax.experimental.pallas import tpu as pltpu


VMEM_LIMIT = 32 * 1024 * 1024  # safe on v5e/v6e/v7x; kernel uses ~2 MiB anyway


def _round_up(x, m):
    return ((x + m - 1) // m) * m


def _pad2d(x, rows, cols):
    pr, pc = rows - x.shape[0], cols - x.shape[1]
    if pr == 0 and pc == 0:
        return x
    return jnp.pad(x, ((0, pr), (0, pc)))


# ----------------------------------------------------------------------------
# Pallas kernel: feature projection  (x @ w), bf16 inputs -> f32 output
# ----------------------------------------------------------------------------
def _proj_kernel(x_ref, w_ref, o_ref):
    o_ref[...] = jnp.dot(x_ref[...], w_ref[...],
                         preferred_element_type=jnp.float32)


def project(x, w_padded, *, tile_r=256):
    """x: [R, K] f32, w_padded: [K, Dp] f32 (Dp multiple of 128) -> [R, Dp] f32."""
    R, K = x.shape
    Dp = w_padded.shape[1]
    tr = tile_r if R >= tile_r else _round_up(R, 8)
    Rp = _round_up(R, tr)

    x_b = _pad2d(x, Rp, K).astype(jnp.bfloat16)
    w_b = w_padded.astype(jnp.bfloat16)

    out = pl.pallas_call(
        _proj_kernel,
        out_shape=jax.ShapeDtypeStruct((Rp, Dp), jnp.float32),
        grid_spec=pltpu.PrefetchScalarGridSpec(
            num_scalar_prefetch=0,
            grid=(Rp // tr,),
            in_specs=[pl.BlockSpec((tr, K), lambda i: (i, 0)),
                      pl.BlockSpec((K, Dp), lambda i: (0, 0))],
            out_specs=pl.BlockSpec((tr, Dp), lambda i: (i, 0)),
        ),
        compiler_params=pltpu.CompilerParams(
            dimension_semantics=("parallel",),
            vmem_limit_bytes=VMEM_LIMIT),
    )(x_b, w_b)
    return out[:R]


# ----------------------------------------------------------------------------
# Pallas kernel: tiled aggregation  adj @ feat  + LeakyReLU + L2 normalize
# ----------------------------------------------------------------------------
def _agg_kernel(adj_ref, feat_ref, emb_ref, norm_ref, acc_ref, *, slope):
    k = pl.program_id(1)

    @pl.when(k == 0)
    def _():
        acc_ref[...] = jnp.zeros_like(acc_ref)

    # bf16 x bf16 -> f32 accumulate on the MXU
    acc_ref[...] += jnp.dot(adj_ref[...], feat_ref[...],
                            preferred_element_type=jnp.float32)

    @pl.when(k == pl.num_programs(1) - 1)
    def _():
        agg = acc_ref[...]
        emb = jnp.where(agg >= 0, agg, slope * agg)          # LeakyReLU
        emb_ref[...] = emb
        # F.normalize(emb, p=2, dim=1):  emb / max(||emb||, 1e-12)
        #   == emb * rsqrt(max(sumsq, 1e-24))   (rsqrt on EUP, mul on VPU)
        sumsq = jnp.sum(emb * emb, axis=1, keepdims=True)
        inv = jax.lax.rsqrt(jnp.maximum(sumsq, 1e-24))
        norm_ref[...] = emb * inv


def aggregate(adj, feat, slope, *, tile_m=256, tile_k=512):
    """adj: [N, N] f32, feat: [N, Dp] f32 (Dp multiple of 128).

    Returns (emb, norm), both [Nm_pad, Dp] f32 (padded rows are zero)."""
    N = adj.shape[0]
    Dp = feat.shape[1]

    tm = tile_m if N >= tile_m else _round_up(N, 8)
    tk = tile_k if N >= tile_k else _round_up(N, 128)
    Nm = _round_up(N, tm)     # row padding
    Nk = _round_up(N, tk)     # contraction padding

    adj_b = _pad2d(adj, Nm, Nk).astype(jnp.bfloat16)
    feat_b = _pad2d(feat, Nk, Dp).astype(jnp.bfloat16)

    kernel = functools.partial(_agg_kernel, slope=float(slope))
    emb, norm = pl.pallas_call(
        kernel,
        out_shape=(jax.ShapeDtypeStruct((Nm, Dp), jnp.float32),
                   jax.ShapeDtypeStruct((Nm, Dp), jnp.float32)),
        grid_spec=pltpu.PrefetchScalarGridSpec(
            num_scalar_prefetch=0,
            grid=(Nm // tm, Nk // tk),
            in_specs=[pl.BlockSpec((tm, tk), lambda i, k: (i, k)),
                      pl.BlockSpec((tk, Dp), lambda i, k: (k, 0))],
            out_specs=(pl.BlockSpec((tm, Dp), lambda i, k: (i, 0)),
                       pl.BlockSpec((tm, Dp), lambda i, k: (i, 0))),
            scratch_shapes=[pltpu.VMEM((tm, Dp), jnp.float32)],
        ),
        compiler_params=pltpu.CompilerParams(
            dimension_semantics=("parallel", "arbitrary"),
            vmem_limit_bytes=VMEM_LIMIT),
    )(adj_b, feat_b)
    return emb, norm


# ----------------------------------------------------------------------------
# One GCN layer (projection + aggregation), lane-dense padded to 128 columns
# ----------------------------------------------------------------------------
def gcn_layer(adj, user_feat, item_feat, u_w, v_w, slope):
    U = user_feat.shape[0]
    I = item_feat.shape[0]
    N = U + I
    in_width = user_feat.shape[1]         # may be padded width from prev layer
    out_dim = u_w.shape[1]
    Dp = _round_up(out_dim, 128)

    # Zero-pad weights: rows to match (possibly padded) input width, cols to 128k.
    # Padded input columns are exactly zero, so results are unchanged.
    u_wp = _pad2d(u_w, in_width, Dp)
    v_wp = _pad2d(v_w, in_width, Dp)

    proj_u = project(user_feat, u_wp)     # [U, Dp]
    proj_i = project(item_feat, v_wp)     # [I, Dp]
    feat = jnp.concatenate([proj_u, proj_i], axis=0)   # [N, Dp] (host-side concat)

    emb_p, norm_p = aggregate(adj, feat, slope)
    emb = emb_p[:N]                       # keep padded (zero) columns for chaining
    norm = norm_p[:N, :out_dim]           # slice true columns for the final concat
    return emb, norm


# ----------------------------------------------------------------------------
# Parameter init (matches nn.init.xavier_uniform_ semantics)
# ----------------------------------------------------------------------------
def xavier_uniform(key, shape):
    fan_in, fan_out = shape
    bound = math.sqrt(6.0 / (fan_in + fan_out))
    return jax.random.uniform(key, shape, dtype=jnp.float32,
                              minval=-bound, maxval=bound)


def init_model_params(key, user_num, item_num, hide_dim, layer_dims):
    keys = jax.random.split(key, 2 + 2 * (len(layer_dims) - 1))
    params = {
        "user_emb": xavier_uniform(keys[0], (user_num, hide_dim)),
        "item_emb": xavier_uniform(keys[1], (item_num, hide_dim)),
        "layers": [],
    }
    for i in range(len(layer_dims) - 1):
        u_w = xavier_uniform(keys[2 + 2 * i], (layer_dims[i], layer_dims[i + 1]))
        v_w = xavier_uniform(keys[3 + 2 * i], (layer_dims[i], layer_dims[i + 1]))
        params["layers"].append((u_w, v_w))
    return params


# ----------------------------------------------------------------------------
# MODEL.forward equivalent
# ----------------------------------------------------------------------------
def model_forward(params, adj, user_num, item_num, slope):
    all_user = [params["user_emb"]]
    all_item = [params["item_emb"]]
    uf, itf = params["user_emb"], params["item_emb"]
    for u_w, v_w in params["layers"]:
        emb, norm = gcn_layer(adj, uf, itf, u_w, v_w, slope)
        all_user.append(norm[:user_num])
        all_item.append(norm[user_num:user_num + item_num])
        # Next layer consumes the *pre-normalization* activated embeddings,
        # exactly as in the PyTorch reference.
        uf, itf = emb[:user_num], emb[user_num:user_num + item_num]
    user_embedding = jnp.concatenate(all_user, axis=1)
    item_embedding = jnp.concatenate(all_item, axis=1)
    return user_embedding, item_embedding


# ----------------------------------------------------------------------------
# main
# ----------------------------------------------------------------------------
if __name__ == "__main__":
    userNum, itemNum = 8, 8
    hide_dim = 32
    layer = [16, 16]
    slope = 0.2
    layer_dims = [hide_dim] + layer

    key = jax.random.PRNGKey(0)
    k_params, k_adj = jax.random.split(key)

    params = init_model_params(k_params, userNum, itemNum, hide_dim, layer_dims)

    # Dense (symmetric, row-normalized) bipartite adjacency, deterministic.
    # TODO(synk): torch.spmm consumes a sparse adjacency; here adj is supplied dense.
    total = userNum + itemNum
    rating = (jax.random.uniform(k_adj, (userNum, itemNum)) > 0.5).astype(jnp.float32)
    adj = jnp.zeros((total, total), dtype=jnp.float32)
    adj = adj.at[:userNum, userNum:].set(rating)
    adj = adj.at[userNum:, :userNum].set(rating.T)
    deg = jnp.maximum(adj.sum(axis=1, keepdims=True), 1.0)
    adj = adj / deg

    user_embedding, item_embedding = model_forward(params, adj, userNum, itemNum, slope)
    jax.block_until_ready((user_embedding, item_embedding))

    expected_dim = hide_dim + sum(layer)
    assert user_embedding.shape == (userNum, expected_dim)
    assert item_embedding.shape == (itemNum, expected_dim)
    assert bool(jnp.all(jnp.isfinite(user_embedding)))
    assert bool(jnp.all(jnp.isfinite(item_embedding)))
    print("KERNEL_OK")
</pallas_src>

<mosaic_0001>
module attributes {stable_mosaic.version = 11 : i64} {
  func.func @_proj_kernel(%arg0: i32, %arg1: memref<8x32xbf16, #tpu.memory_space<vmem>>, %arg2: memref<32x128xbf16, #tpu.memory_space<vmem>>, %arg3: memref<8x128xf32, #tpu.memory_space<vmem>>) attributes {dimension_semantics = [#tpu.dimension_semantics<parallel>], iteration_bounds = array<i64: 1>, scalar_prefetch = 0 : i64, scratch_operands = 0 : i64, tpu.core_type = #tpu.core_type<tc>, window_params = [{transform_indices = @transform_0, window_bounds = array<i64: 8, 32>}, {pipeline_mode = #tpu.pipeline_mode<synchronous>, transform_indices = @transform_1, window_bounds = array<i64: 32, 128>}, {transform_indices = @transform_2, window_bounds = array<i64: 8, 128>}]} {
    %c0 = arith.constant 0 : index
    %c0_0 = arith.constant 0 : index
    %0 = vector.load %arg1[%c0, %c0_0] : memref<8x32xbf16, #tpu.memory_space<vmem>>, vector<8x32xbf16>
    %c0_1 = arith.constant 0 : index
    %c0_2 = arith.constant 0 : index
    %1 = vector.load %arg2[%c0_1, %c0_2] : memref<32x128xbf16, #tpu.memory_space<vmem>>, vector<32x128xbf16>
    %cst = arith.constant dense<0.000000e+00> : vector<8x128xf32>
    %2 = tpu.matmul %0, %1, %cst {dimension_numbers = #tpu.dot_dimension_numbers<[1], [0], [0], [1], [0, 0, 1, 1], [], []>} : vector<8x32xbf16>, vector<32x128xbf16>, vector<8x128xf32> -> vector<8x128xf32>
    %c0_3 = arith.constant 0 : index
    %c0_4 = arith.constant 0 : index
    %3 = vector.load %arg3[%c0_3, %c0_4] : memref<8x128xf32, #tpu.memory_space<vmem>>, vector<8x128xf32>
    tpu.vector_store %arg3[%c0_3, %c0_4], %2 {strides = array<i32>} : memref<8x128xf32, #tpu.memory_space<vmem>>, vector<8x128xf32>,
    return
  }
  func.func @transform_0(%arg0: i32) -> (i32, i32) {
    %c0_i32 = arith.constant 0 : i32
    %c0_i32_0 = arith.constant 0 : i32
    return %arg0, %c0_i32 : i32, i32
  }
  func.func @transform_1(%arg0: i32) -> (i32, i32) {
    %c0_i32 = arith.constant 0 : i32
    %c0_i32_0 = arith.constant 0 : i32
    %c0_i32_1 = arith.constant 0 : i32
    return %c0_i32, %c0_i32_0 : i32, i32
  }
  func.func @transform_2(%arg0: i32) -> (i32, i32) {
    %c0_i32 = arith.constant 0 : i32
    %c0_i32_0 = arith.constant 0 : i32
    return %arg0, %c0_i32 : i32, i32
  }
}

</mosaic_0001>

<bundles_post_ra>
// kernel: tpu_custom_call.1
= control target key start
LH: loop header
LB: loop body
LE: loop exit
PB: predicated region body
PF: predicated region fallthrough
CT: control target
= control target key end

     0   :  { %7 = vsyncpa [#allocation3], 0  ;;  %s237_s0 = inlined_call_operand.hbm [shape: bf16[8,32], index: 0, kind: input, shape index: {}]   ;;  %s238_s1 = inlined_call_operand.hbm [shape: bf16[32,128], index: 1, kind: input, shape index: {}]   ;;  %s239_s2 = inlined_call_operand.hbm [shape: f32[8,128], index: 2, kind: output, shape index: {}]  }
   0x1   :  { %8 = vsyncpa [#allocation6], 0 }
   0x2   :  { %9 = vsyncpa [#allocation4], 0  ;;  %s206_s9 = smov [#allocation2]   ;;  %s207_s11 = smov [#allocation5]  }
   0x3   :  { %s16_s10 = sshll.u32 %s206_s9, 4  ;;  %s25_s12 = sshll.u32 %s207_s11, 4  ;;  %s17_s10 = int_to_ptr.vmem [resolvable:$true] %s16_s10  ;;  %s26_s12 = int_to_ptr.vmem [resolvable:$true] %s25_s12 }
   0x4   :  { %s148_s13 = scalar_lea.vmem %s17_s10, 64  ;;  %p153_p1 = scmp.lt.s32.totalorder %s17_s10, %s17_s10 }
   0x5   :  { %p149_p0 = scmp.ne.s32.totalorder %s17_s10, %s148_s13  ;;  %p154_p2 = scmp.lt.s32.totalorder %s148_s13, %s148_s13 }
   0x7   :  { %p155_p3 = por %p154_p2, %p153_p1 }
   0x9   :  { %p156_p4 = pnand %p155_p3, %p149_p0 }
   0xb   :  { %159 = shalt.err (!%p156_p4)
}
   0xc   :  { %19 = dma.hbm_to_vmem [thread:$0]  %s237_s0, 64, %s17_s10, [#allocation3]  }
   0xd   :  { %s168_s16 = scalar_lea.vmem %s26_s12, 256  ;;  %p173_p6 = scmp.lt.s32.totalorder %s26_s12, %s26_s12 }
   0xe   :  { %p169_p5 = scmp.ne.s32.totalorder %s26_s12, %s168_s16  ;;  %p174_p7 = scmp.lt.s32.totalorder %s168_s16, %s168_s16 }
  0x10   :  { %p175_p8 = por %p174_p7, %p173_p6 }
  0x12   :  { %p176_p9 = pnand %p175_p8, %p169_p5 }
  0x14   :  { %179 = shalt.err (!%p176_p9)
}
  0x15   :  { %s208_s17 = smov 64   ;;  %s209_s18 = smov 4  }
  0x16   :  { %31 = dma.hbm_to_vmem [thread:$0]  %s238_s1, 256, %s26_s12, [#allocation6], %s208_s17, %s208_s17, %s209_s18  }
  0x17   :  { %200 = dma.done.wait [#allocation3], 64  }
  0x18   :  { %201 = vsyncadd [#allocation3], 4294967232 }
  0x19   :  { %202 = dma.done.wait [#allocation6], 256  }
  0x1a   :  { %203 = vsyncadd [#allocation6], 4294967040  ;;  %v210_v0 = vmov 0.0   ;;  %vm211_vm0 = vmmov 0   ;;  %v138_v1 = vld [vmem:[#allocation5 + $0x8] sm:$0xff]   ;;  %v139_v2 = vld [vmem:[#allocation5] sm:$0xff]  }
  0x1b   :  { %123 = vmatprep.subr.bf16.mxu0 %v210_v0  ;;  %127 = vmatprep.mubr.msk.bf16.mxu0 %vm211_vm0, %v210_v0  ;;  %v39_v3 = vld [vmem:[#allocation2] sm:$0xf]  ;;  %vm56_vm1 = vcmask 261120   ;;  %s212_s0 = smov [#allocation7]  }
  0x1c   :  { %124 = vmatpush3.bf16.msra.mxu0 %v138_v1  ;;  %s107_s21 = sshll.u32 %s212_s0, 4  ;;  %s108_s21 = int_to_ptr.vmem [resolvable:$true] %s107_s21 }
  0x1d   :  { %125 = vmatprep.subr.bf16.mxu0 %v210_v0  ;;  %s180_s1 = scalar_lea.vmem %s108_s21, 128  ;;  %p185_p11 = scmp.lt.s32.totalorder %s108_s21, %s108_s21 }
  0x1e   :  { %p181_p10 = scmp.ne.s32.totalorder %s108_s21, %s180_s1  ;;  %p186_p12 = scmp.lt.s32.totalorder %s180_s1, %s180_s1 }
  0x20   :  { %126 = vmatpush3.bf16.msra.mxu0 %v139_v2  ;;  %p187_p13 = por %p186_p12, %p185_p11 }
  0x22   :  { %p188_p0 = pnand %p187_p13, %p181_p10 }
  0x23   :  { %128 = vmatmul.mubr.msk.bf16.vlgmr.msra.gmra.mxu0 %vm56_vm1, %v39_v3 }
  0xe3   :  { %v94_v4 = vpop.f32.mrf.mxu0 }
  0xe4   :  { %100 = vst [vmem:[#allocation7] sm:$0xff] %v94_v4 }
  0xe5   :  { %v129_v5 = vpop.f32.mrf.mxu0 }
  0xe6   :  { %191 = shalt.err (!%p188_p0)
}
  0xe7   :  { %110 = dma.vmem_to_hbm [thread:$0]  %s108_s21, 128, %s239_s2, [#allocation4]   ;;  %v97_v6 = vpop.f32.mrf.mxu0 }
  0xe9   :  { %v130_v7 = vpop.f32.mrf.mxu0 }
  0xea   :  { %204 = dma.done.wait [#allocation4], 128  }
  0xeb   :  { %205 = vsyncadd [#allocation4], 4294967168 }
  0xec   :  { %114 = vsyncpa [#allocation3], 1 }
  0xed   :  { %115 = vsyncpa [#allocation6], 1 }
  0xee   :  { %116 = vsyncpa [#allocation4], 1 }

</bundles_post_ra>
